<compile_context>
chip_gen: v5e
topology: v5e:2x2
jax: 0.10.0
libtpu: 0.0.40
codegen_flags: <defaults>
</compile_context>

<pallas_src>
import functools

import jax
import jax.numpy as jnp
from jax.experimental import pallas as pl
from jax.experimental.pallas import tpu as pltpu

_EPS = 0.01        # BatchNorm1d(eps=0.01) from the module spec.
_HIDDEN = 256      # fc0 output width.
_N_OUT = 7         # fc1 output width.
_LANE = 128
_MIN_HW_STEPS = 3                      # keep >= 3 spatial grid steps when possible
_TILE_VMEM_BUDGET = 8 * 1024 * 1024    # per-core budget: f32 intermediates + x tile


def _round_up(n, m):
    return (n + m - 1) // m * m


def _cdiv(a, b):
    return -(-a // b)


# ---------------------------------------------------------------------------
# Backbone kernel: 1x1-conv stand-in -> ReLU -> global-average-pool partials.
# Grid = (batch, hw_tiles): batch is "parallel" (both TCs on v7x), hw is the
# carried-accumulator reduction axis ("arbitrary", innermost).
# ---------------------------------------------------------------------------
def _backbone_kernel(x_ref, wct_ref, bc_ref, embs_ref, acc_ref, *,
                     hw_true, tp, needs_mask):
    """
      x_ref   : (1, C, TP)    bf16  spatial tile of one image (channels-first)
      wct_ref : (F_pad, C)    bf16  transposed 1x1-conv weight (resident)
      bc_ref  : (F_pad, 1)    f32   conv bias column (resident)
      embs_ref: (1, F_pad, 1) f32   per-image GAP embedding (written on last tile)
      acc_ref : (F_pad, 128)  f32   lane-folded running spatial sum (scratch)
    """
    hw_step = pl.program_id(1)

    @pl.when(hw_step == 0)
    def _():
        acc_ref[...] = jnp.zeros_like(acc_ref)

    # Flipped matmul orientation: (F_pad, C) @ (C, TP).  No per-batch transpose
    # or concat; MXU N-dim = TP fills the 256-wide MXU on v6e/v7x.
    xb = x_ref[0].astype(wct_ref.dtype)                        # (C, TP) bf16
    conv = jnp.dot(wct_ref[...], xb,
                   preferred_element_type=jnp.float32)         # (F_pad, TP) f32
    feat = jnp.maximum(conv + bc_ref[...], 0.0)                # conv bias + ReLU

    if needs_mask:
        # Zero spatially padded pixels so GAP stays exact (static flag: free
        # when H*W already tiles evenly).
        col = jax.lax.broadcasted_iota(jnp.int32, feat.shape, 1) + hw_step * tp
        feat = jnp.where(col < hw_true, feat, 0.0)

    # Fold the TP/128 lane-groups into one 128-lane partial with VPU adds over
    # static lane-aligned slices.  Keeps the accumulator at a constant 64 KiB
    # (so tiles can be large) and the per-step vector-store traffic tiny (v5e
    # has a single vst slot).  The single cross-lane XLU reduce runs once per
    # image in the finalize below, not per tile.
    partial = feat[:, 0:_LANE]
    for g in range(1, tp // _LANE):
        partial = partial + feat[:, g * _LANE:(g + 1) * _LANE]
    acc_ref[...] += partial

    @pl.when(hw_step == pl.num_programs(1) - 1)
    def _():
        gap = acc_ref[...].sum(axis=1, keepdims=True) * (1.0 / hw_true)  # (F_pad,1)
        # (F_pad,1) -> (1,F_pad,1) only adds a leading unit dim (free); this
        # 512 B per-image writeback is negligible, so lane-density is moot here.
        embs_ref[...] = gap.reshape(embs_ref.shape)


# ---------------------------------------------------------------------------
# Head kernel: fc0 -> ReLU -> BN(256) -> fc1 -> ReLU -> BN(7), train-mode
# batch statistics.  Whole batch, everything resident in VMEM (tiny).
# ---------------------------------------------------------------------------
def _head_kernel(embs_ref, w0_ref, w1_ref, vec_ref, out_ref):
    """
      embs_ref: (B, F_pad)   f32
      w0_ref  : (F_pad, 256) bf16
      w1_ref  : (256, N_pad) bf16   (7 real columns, zero-padded)
      vec_ref : (8, 256)     f32    rows: [b0, g0, beta0, b1, g1, beta1, -, -]
      out_ref : (B, N_pad)   f32    lane-dense head output
    """
    hidden = w0_ref.shape[1]
    n_pad = w1_ref.shape[1]
    b0, g0, beta0 = (vec_ref[0:1, :hidden], vec_ref[1:2, :hidden],
                     vec_ref[2:3, :hidden])
    b1, g1, beta1 = (vec_ref[3:4, :n_pad], vec_ref[4:5, :n_pad],
                     vec_ref[5:6, :n_pad])

    embs = embs_ref[...]                                        # (B, F_pad) f32

    # fc0 -> ReLU -> BatchNorm1d(256, eps=0.01), train-mode batch stats.
    h = jnp.dot(embs.astype(w0_ref.dtype), w0_ref[...],
                preferred_element_type=jnp.float32) + b0
    h = jnp.maximum(h, 0.0)
    mu0 = jnp.mean(h, axis=0, keepdims=True)
    var0 = jnp.mean((h - mu0) ** 2, axis=0, keepdims=True)      # biased variance
    h = (h - mu0) * jax.lax.rsqrt(var0 + _EPS) * g0 + beta0

    # fc1 -> ReLU -> BatchNorm1d(7, eps=0.01); padded columns have gamma=0.
    z = jnp.dot(h.astype(w1_ref.dtype), w1_ref[...],
                preferred_element_type=jnp.float32) + b1
    z = jnp.maximum(z, 0.0)
    mu1 = jnp.mean(z, axis=0, keepdims=True)
    var1 = jnp.mean((z - mu1) ** 2, axis=0, keepdims=True)
    out_ref[...] = (z - mu1) * jax.lax.rsqrt(var1 + _EPS) * g1 + beta1


def custom_net_forward(x_nchw, params):
    """Returns (embs, output) exactly like CustomNet.forward (train mode).

    TODO(synk): the scalar_means/scalar_stds feature_wise_scaling branch is not
    implemented (it is skipped when they are None, as in the default module).
    """
    b_sz, c_in, h_dim, w_dim = x_nchw.shape
    hw_true = h_dim * w_dim
    wct, bc = params['wct'], params['bc']
    w0, w1, vecs = params['w0'], params['w1'], params['vecs']
    f_pad = wct.shape[0]
    n_pad = w1.shape[1]
    in_features, n_out = params['in_features'], params['n_out']

    # ---- spatial tile selection -------------------------------------------
    # Budget the f32 conv/ReLU intermediate (the dominant VMEM consumer) plus
    # the double-buffered bf16 x tile; the lane-folded accumulator is a
    # constant 64 KiB.  tp is a multiple of 128; aim for >= _MIN_HW_STEPS hw
    # grid steps so the input DMA pipeline overlaps compute.
    bytes_per_lane = 2 * f_pad * 4 + 2 * c_in * 2
    tp_cap = max(_LANE, (_TILE_VMEM_BUDGET // bytes_per_lane) // _LANE * _LANE)
    hw_pad = _round_up(hw_true, _LANE)
    n_steps = max(_cdiv(hw_pad, tp_cap), min(_MIN_HW_STEPS, hw_pad // _LANE), 1)
    tp = _round_up(_cdiv(hw_pad, n_steps), _LANE)
    p_final = n_steps * tp
    needs_mask = (p_final != hw_true)

    # NCHW -> (B, C, H*W) is a FREE reshape (no transpose).  bf16 halves DMA
    # bytes and the VMEM tile footprint (the conv consumes bf16 anyway).
    # NOTE: if x arrives as a standalone f32 HBM array this cast is one extra
    # HBM pass; feed bf16 (or a fused producer) upstream when possible.
    x = x_nchw.reshape(b_sz, c_in, hw_true).astype(jnp.bfloat16)
    if needs_mask:
        x = jnp.pad(x, ((0, 0), (0, 0), (0, p_final - hw_true)))

    backbone = functools.partial(_backbone_kernel, hw_true=hw_true, tp=tp,
                                 needs_mask=needs_mask)

    # TODO(synk): `original.children()[:-1]` (the real pretrained backbone) is
    # unspecified; a 1x1-conv + global-average-pool stand-in producing
    # `in_features` channels is used so the head sees a (B, in_features)
    # embedding, matching `output.view(B, -1)`.
    embs3 = pl.pallas_call(
        backbone,
        grid_spec=pltpu.PrefetchScalarGridSpec(
            num_scalar_prefetch=0,
            grid=(b_sz, n_steps),
            in_specs=[
                pl.BlockSpec((1, c_in, tp), lambda bi, hi: (bi, 0, hi)),  # x tile
                pl.BlockSpec((f_pad, c_in), lambda bi, hi: (0, 0)),       # wcT resident
                pl.BlockSpec((f_pad, 1), lambda bi, hi: (0, 0)),          # conv bias
            ],
            out_specs=pl.BlockSpec((1, f_pad, 1), lambda bi, hi: (bi, 0, 0)),
            scratch_shapes=[pltpu.VMEM((f_pad, _LANE), jnp.float32)],
        ),
        out_shape=jax.ShapeDtypeStruct((b_sz, f_pad, 1), jnp.float32),
        compiler_params=pltpu.CompilerParams(
            dimension_semantics=("parallel", "arbitrary"),  # batch across TCs (v7x)
            vmem_limit_bytes=48 * 1024 * 1024),             # v7x-safe (<64 MiB)
    )(x, wct, bc)

    embs_pad = embs3.reshape(b_sz, f_pad)   # drop trailing unit dim (free)

    # Tiny whole-batch head: BatchNorm needs full-batch statistics, so it is
    # deliberately NOT sharded across the parallel grid.  All operands resident.
    out_pad = pl.pallas_call(
        _head_kernel,
        out_shape=jax.ShapeDtypeStruct((b_sz, n_pad), jnp.float32),
    )(embs_pad, w0, w1, vecs)

    # Strip lane padding (head output store was a full unmasked 128-lane vst).
    return embs_pad[:, :in_features], out_pad[:, :n_out]


def init_params(key, c_in=4, in_features=64):
    """PyTorch-equivalent init, pre-padded / packed for lane-dense kernel use."""
    f_pad = _round_up(in_features, _LANE)
    n_pad = _round_up(_N_OUT, _LANE)
    ks = jax.random.split(key, 5)

    def xavier_normal(k, fan_in, fan_out):
        std = (2.0 / (fan_in + fan_out)) ** 0.5
        return std * jax.random.normal(k, (fan_in, fan_out), jnp.float32)

    # 1x1-conv stand-in (c_in -> in_features), stored TRANSPOSED (F_pad, C) so
    # the in-kernel matmul needs no transpose; rows beyond in_features are zero.
    wct = jnp.zeros((f_pad, c_in), jnp.float32).at[:in_features, :].set(
        xavier_normal(ks[0], c_in, in_features).T)
    bc = jnp.zeros((f_pad, 1), jnp.float32)          # conv bias column

    # fc0: Linear(in_features, 256) -- xavier_normal_ weight, default-uniform bias.
    w0 = jnp.zeros((f_pad, _HIDDEN), jnp.float32).at[:in_features, :].set(
        xavier_normal(ks[1], in_features, _HIDDEN))
    b0 = ((jax.random.uniform(ks[2], (_HIDDEN,), jnp.float32) - 0.5)
          * 2.0 / (in_features ** 0.5))

    # fc1: Linear(256, 7), columns zero-padded to n_pad lanes.
    w1 = jnp.zeros((_HIDDEN, n_pad), jnp.float32).at[:, :_N_OUT].set(
        xavier_normal(ks[3], _HIDDEN, _N_OUT))
    b1 = jnp.zeros((n_pad,), jnp.float32).at[:_N_OUT].set(
        (jax.random.uniform(ks[4], (_N_OUT,), jnp.float32) - 0.5)
        * 2.0 / (_HIDDEN ** 0.5))

    # BatchNorm1d affine (PyTorch default weight=1, bias=0); padded columns get
    # gamma=0 so they remain exactly 0 through the head.
    g0, beta0 = jnp.ones((_HIDDEN,), jnp.float32), jnp.zeros((_HIDDEN,), jnp.float32)
    g1 = jnp.zeros((n_pad,), jnp.float32).at[:_N_OUT].set(1.0)
    beta1 = jnp.zeros((n_pad,), jnp.float32)

    # Pack the head's per-feature vectors into ONE lane-aligned (8, 256) f32
    # table -> a single DMA descriptor instead of six.
    vw = max(_HIDDEN, n_pad)
    vecs = jnp.zeros((8, vw), jnp.float32)
    vecs = vecs.at[0, :_HIDDEN].set(b0)
    vecs = vecs.at[1, :_HIDDEN].set(g0)
    vecs = vecs.at[2, :_HIDDEN].set(beta0)
    vecs = vecs.at[3, :n_pad].set(b1)
    vecs = vecs.at[4, :n_pad].set(g1)
    vecs = vecs.at[5, :n_pad].set(beta1)

    return dict(
        wct=wct.astype(jnp.bfloat16),   # matmul weights in bf16 (f32 accumulation)
        bc=bc,                          # conv bias stays f32
        w0=w0.astype(jnp.bfloat16),
        w1=w1.astype(jnp.bfloat16),
        vecs=vecs,                      # BN/bias vectors stay f32
        in_features=in_features, n_out=_N_OUT)


if __name__ == "__main__":
    key = jax.random.PRNGKey(0)
    k_x, k_p = jax.random.split(key)

    # Small demo shapes: batch=2, channels=4, spatial 16x16, in_features=64.
    # (Batch >= 8 would fill the MXU rows / make BN stats sensible; B=2 is demo.)
    x = jax.random.normal(k_x, (2, 4, 16, 16), jnp.float32)
    params = init_params(k_p, c_in=4, in_features=64)

    embs, out = custom_net_forward(x, params)
    jax.block_until_ready((embs, out))

    assert embs.shape == (2, 64) and out.shape == (2, 7)
    assert bool(jnp.all(jnp.isfinite(embs))) and bool(jnp.all(jnp.isfinite(out)))
    print("KERNEL_OK")
</pallas_src>

<mosaic_0001>
module attributes {stable_mosaic.version = 11 : i64} {
  func.func @_backbone_kernel(%arg0: i32, %arg1: i32, %arg2: memref<1x4x128xbf16, #tpu.memory_space<vmem>>, %arg3: memref<128x4xbf16, #tpu.memory_space<vmem>>, %arg4: memref<128x1xf32, #tpu.memory_space<vmem>>, %arg5: memref<1x128x1xf32, #tpu.memory_space<vmem>>, %arg6: memref<128x128xf32, #tpu.memory_space<vmem>>) attributes {dimension_semantics = [#tpu.dimension_semantics<parallel>, #tpu.dimension_semantics<arbitrary>], iteration_bounds = array<i64: 2, 2>, scalar_prefetch = 0 : i64, scratch_operands = 1 : i64, tpu.core_type = #tpu.core_type<tc>, window_params = [{transform_indices = @transform_0, window_bounds = array<i64: 1, 4, 128>}, {pipeline_mode = #tpu.pipeline_mode<synchronous>, transform_indices = @transform_1, window_bounds = array<i64: 128, 4>}, {pipeline_mode = #tpu.pipeline_mode<synchronous>, transform_indices = @transform_2, window_bounds = array<i64: 128, 1>}, {transform_indices = @transform_3, window_bounds = array<i64: 1, 128, 1>}]} {
    %c0_i32 = arith.constant 0 : i32
    %0 = arith.cmpi eq, %arg1, %c0_i32 : i32
    %1 = arith.extui %0 : i1 to i32
    %c0_i32_0 = arith.constant 0 : i32
    %2 = arith.cmpi ne, %1, %c0_i32_0 : i32
    scf.if %2 {
      %cst_13 = arith.constant 0.000000e+00 : f32
      %18 = vector.broadcast %cst_13 : f32 to vector<128x128xf32>
      %c0_14 = arith.constant 0 : index
      %c0_15 = arith.constant 0 : index
      %19 = vector.load %arg6[%c0_14, %c0_15] : memref<128x128xf32, #tpu.memory_space<vmem>>, vector<128x128xf32>
      tpu.vector_store %arg6[%c0_14, %c0_15], %18 {strides = array<i32>} : memref<128x128xf32, #tpu.memory_space<vmem>>, vector<128x128xf32>,
    } else {
    }
    %c0 = arith.constant 0 : index
    %c0_1 = arith.constant 0 : index
    %c0_2 = arith.constant 0 : index
    %3 = vector.load %arg2[%c0, %c0_1, %c0_2] : memref<1x4x128xbf16, #tpu.memory_space<vmem>>, vector<1x4x128xbf16>
    %4 = vector.shape_cast %3 : vector<1x4x128xbf16> to vector<4x128xbf16>
    %c0_3 = arith.constant 0 : index
    %c0_4 = arith.constant 0 : index
    %5 = vector.load %arg3[%c0_3, %c0_4] : memref<128x4xbf16, #tpu.memory_space<vmem>>, vector<128x4xbf16>
    %cst = arith.constant dense<0.000000e+00> : vector<128x128xf32>
    %6 = tpu.matmul %5, %4, %cst {dimension_numbers = #tpu.dot_dimension_numbers<[1], [0], [0], [1], [0, 0, 1, 1], [], []>} : vector<128x4xbf16>, vector<4x128xbf16>, vector<128x128xf32> -> vector<128x128xf32>
    %c0_5 = arith.constant 0 : index
    %c0_6 = arith.constant 0 : index
    %7 = vector.load %arg4[%c0_5, %c0_6] : memref<128x1xf32, #tpu.memory_space<vmem>>, vector<128x1xf32>
    %8 = vector.broadcast %7 : vector<128x1xf32> to vector<128x128xf32>
    %9 = arith.addf %6, %8 : vector<128x128xf32>
    %cst_7 = arith.constant 0.000000e+00 : f32
    %10 = vector.broadcast %cst_7 : f32 to vector<128x128xf32>
    %11 = arith.maximumf %9, %10 : vector<128x128xf32>
    %c0_8 = arith.constant 0 : index
    %c0_9 = arith.constant 0 : index
    %12 = vector.load %arg6[%c0_8, %c0_9] : memref<128x128xf32, #tpu.memory_space<vmem>>, vector<128x128xf32>
    %13 = arith.addf %12, %11 : vector<128x128xf32>
    %c0_10 = arith.constant 0 : index
    %c0_11 = arith.constant 0 : index
    %14 = vector.load %arg6[%c0_10, %c0_11] : memref<128x128xf32, #tpu.memory_space<vmem>>, vector<128x128xf32>
    tpu.vector_store %arg6[%c0_10, %c0_11], %13 {strides = array<i32>} : memref<128x128xf32, #tpu.memory_space<vmem>>, vector<128x128xf32>,
    %c1_i32 = arith.constant 1 : i32
    %15 = arith.cmpi eq, %arg1, %c1_i32 : i32
    %16 = arith.extui %15 : i1 to i32
    %c0_i32_12 = arith.constant 0 : i32
    %17 = arith.cmpi ne, %16, %c0_i32_12 : i32
    scf.if %17 {
      %c0_13 = arith.constant 0 : index
      %c0_14 = arith.constant 0 : index
      %18 = vector.load %arg6[%c0_13, %c0_14] : memref<128x128xf32, #tpu.memory_space<vmem>>, vector<128x128xf32>
      %cst_15 = arith.constant dense<0.000000e+00> : vector<128xf32>
      %19 = vector.multi_reduction <add>, %18, %cst_15 [1] : vector<128x128xf32> to vector<128xf32>
      %20 = vector.shape_cast %19 : vector<128xf32> to vector<128x1xf32>
      %cst_16 = arith.constant 3.906250e-03 : f32
      %21 = vector.broadcast %cst_16 : f32 to vector<128x1xf32>
      %22 = arith.mulf %20, %21 : vector<128x1xf32>
      %23 = vector.shape_cast %22 : vector<128x1xf32> to vector<1x128x1xf32>
      %c0_17 = arith.constant 0 : index
      %c0_18 = arith.constant 0 : index
      %c0_19 = arith.constant 0 : index
      %24 = vector.load %arg5[%c0_17, %c0_18, %c0_19] : memref<1x128x1xf32, #tpu.memory_space<vmem>>, vector<1x128x1xf32>
      tpu.vector_store %arg5[%c0_17, %c0_18, %c0_19], %23 {strides = array<i32>} : memref<1x128x1xf32, #tpu.memory_space<vmem>>, vector<1x128x1xf32>,
    } else {
    }
    return
  }
  func.func @transform_0(%arg0: i32, %arg1: i32) -> (i32, i32, i32) {
    %c0_i32 = arith.constant 0 : i32
    %c0_i32_0 = arith.constant 0 : i32
    return %arg0, %c0_i32, %arg1 : i32, i32, i32
  }
  func.func @transform_1(%arg0: i32, %arg1: i32) -> (i32, i32) {
    %c0_i32 = arith.constant 0 : i32
    %c0_i32_0 = arith.constant 0 : i32
    %c0_i32_1 = arith.constant 0 : i32
    return %c0_i32, %c0_i32_0 : i32, i32
  }
  func.func @transform_2(%arg0: i32, %arg1: i32) -> (i32, i32) {
    %c0_i32 = arith.constant 0 : i32
    %c0_i32_0 = arith.constant 0 : i32
    %c0_i32_1 = arith.constant 0 : i32
    return %c0_i32, %c0_i32_0 : i32, i32
  }
  func.func @transform_3(%arg0: i32, %arg1: i32) -> (i32, i32, i32) {
    %c0_i32 = arith.constant 0 : i32
    %c0_i32_0 = arith.constant 0 : i32
    %c0_i32_1 = arith.constant 0 : i32
    return %arg0, %c0_i32, %c0_i32_0 : i32, i32, i32
  }
}

</mosaic_0001>

<bundles_post_ra>
// kernel: tpu_custom_call.1
= control target key start
LH: loop header
LB: loop body
LE: loop exit
PB: predicated region body
PF: predicated region fallthrough
CT: control target
= control target key end

     0   :  { %s839_s12 = smov 0   ;;  %s841_s13 = smov 0   ;;  %s1019_s0 = inlined_call_operand.vmem [shape: bf16[2,4,256], index: 0, kind: input, shape index: {}]   ;;  %s1020_s1 = inlined_call_operand.vmem [shape: bf16[128,4], index: 1, kind: input, shape index: {}]   ;;  %s1021_s2 = inlined_call_operand.vmem [shape: f32[128,1], index: 2, kind: input, shape index: {}]   ;;  %s1022_s3 = inlined_call_operand.vmem [shape: f32[2,128,1], index: 3, kind: output, shape index: {}]  }
   0x1   :  { %s843_s14 = smov 0   ;;  %s845_s15 = smov 0  }
   0x2   :  { %s847_s16 = smov 0  }
   0x3 LB: > { %s22_s17 = sadd.s32 1, %s807_s14  ;;  %s25_s18 = sadd.s32 1, %s811_s15  ;;  %s815_s16 = sphi %s847_s16, %s13_s16   ;;  %s811_s15 = sphi %s845_s15, %s1026_s15   ;;  %s807_s14 = sphi %s843_s14, %s1025_s14   ;;  %s803_s13 = sphi %s841_s13, %s1024_s13   ;;  %s799_s12 = sphi %s839_s12, %s1023_s12  }
   0x4   : > { %p23_p0 = scmp.ge.s32.totalorder %s22_s17, 2  ;;  %p671_p1 = scmp.ge.s32.totalorder %s815_s16, 1 }
   0x5   : > { %p154_p2 = scmp.lt.s32.totalorder %s815_s16, 5 }
   0x6   : > { %s1028_s17 = smov (%p23_p0, %s22_s17), 0  ;;  %s1030_s18 = smov (!%p23_p0, %s25_s18), %s811_s15 }
   0x7   : > { %p155_p3 = pnand %p671_p1, %p154_p2  ;;  %p27_p4 = scmp.ge.s32.totalorder %s1030_s18, 2 }
   0x8   : > { %p181_p5 = scmp.lt.s32.totalorder (!%p155_p3), %s803_s13, 1  ;;  %p183_p6 = scmp.lt.s32.totalorder (!%p155_p3), %s799_s12, 1 }
   0x9   : > { %s1032_s18 = smov (%p27_p4, %s1030_s18), 0  ;;  %158 = sbr.rel (%p155_p3) target bundleno = 371 (0x173), region = 32 }
   0xa   : > { %p676_p7 = scmp.ne.s32.totalorder (!%p155_p3), %s799_s12, 0 }
   0xe   : > { %s1034_s13 = smov (!%p181_p5, %s803_s13), 1 }
   0xf   : > { %s184_s19 = scalar_select %p183_p6, %s799_s12, 1 }
  0x10   : > { %s672_s20 = sshll.u32 %s1034_s13, 1  ;;  %s720_s21 = sshll.u32 %s1034_s13, 7 }
  0x11   : > { %s186_s22 = sadd.s32 %s672_s20, %s184_s19  ;;  %s876_s25 = scalar_lea.vmem %s1022_s3, %s720_s21 }
  0x12   : > { %s673_s26 = sshll.u32 %s186_s22, 1  ;;  %198 = sbr.rel (%p676_p7) target bundleno = 40 (0x28), region = 36 }
  0x13   : > { %s188_s29 = scalar_lea.vmem %s1019_s0, %s673_s26 }
  0x17   : > { %v817_v0 = vmov 0.0  }
  0x18   : > { %199 = vst [vmem:[#allocation2 + $0x30] sm:$0xff] %v817_v0 }
  0x19   : > { %200 = vst [vmem:[#allocation2] sm:$0xff] %v817_v0 }
  0x1a   : > { %201 = vst [vmem:[#allocation2 + $0x58] sm:$0xff] %v817_v0 }
  0x1b   : > { %202 = vst [vmem:[#allocation2 + $0x18] sm:$0xff] %v817_v0 }
  0x1c   : > { %203 = vst [vmem:[#allocation2 + $0x50] sm:$0xff] %v817_v0 }
  0x1d   : > { %204 = vst [vmem:[#allocation2 + $0x68] sm:$0xff] %v817_v0 }
  0x1e   : > { %205 = vst [vmem:[#allocation2 + $0x8] sm:$0xff] %v817_v0 }
  0x1f   : > { %206 = vst [vmem:[#allocation2 + $0x48] sm:$0xff] %v817_v0 }
  0x20   : > { %207 = vst [vmem:[#allocation2 + $0x40] sm:$0xff] %v817_v0 }
  0x21   : > { %208 = vst [vmem:[#allocation2 + $0x20] sm:$0xff] %v817_v0 }
  0x22   : > { %209 = vst [vmem:[#allocation2 + $0x10] sm:$0xff] %v817_v0 }
  0x23   : > { %210 = vst [vmem:[#allocation2 + $0x38] sm:$0xff] %v817_v0 }
  0x24   : > { %211 = vst [vmem:[#allocation2 + $0x60] sm:$0xff] %v817_v0 }
  0x25   : > { %212 = vst [vmem:[#allocation2 + $0x70] sm:$0xff] %v817_v0 }
  0x26   : > { %213 = vst [vmem:[#allocation2 + $0x78] sm:$0xff] %v817_v0 }
  0x27   : > { %214 = vst [vmem:[#allocation2 + $0x28] sm:$0xff] %v817_v0 }
  0x28 PF: > { %v234_v1 = vld [vmem:[%s1021_s2 + $0x10] sm:$0xff]  ;;  %v232_v2 = vld [vmem:[%s1021_s2] sm:$0xff]  ;;  %vm393_vm0 = vcmask 1041408   ;;  %v818_v4 = vmov 0   ;;  %vm368_vm1 = vcmask 31744   ;;  %v235_v11 = vld [vmem:[%s1021_s2 + $0x18] sm:$0xff] }
  0x29   : > { %v215_v3 = vld [vmem:[%s188_s29] sm:$0x3]  ;;  %775 = vset.pattern.permute.xlu1 %v818_v4  ;;  %774 = vset.pattern.permute.xlu0 %v818_v4  ;;  %v723_v7 = vld [vmem:[%s1020_s1 + $0x10] sm:$0xff]  ;;  %v233_v12 = vld [vmem:[%s1021_s2 + $0x8] sm:$0xff]  ;;  %p717_p8 = scmp.ne.s32.totalorder %s799_s12, 1 }
  0x2a   : > { %v395_v5 = vsel %vm393_vm0, %v215_v3, 0  ;;  %260 = vperm.xlu1 %775, %v234_v1   ;;  %250 = vperm.xlu0 %774, %v232_v2   ;;  %v721_v6 = vld [vmem:[%s1020_s1] sm:$0xff]  ;;  %v727_v9 = vld [vmem:[%s1020_s1 + $0x30] sm:$0xff]  ;;  %v237_v13 = vld [vmem:[%s1021_s2 + $0x28] sm:$0xff] }
  0x2b   : > { %404 = vmatpush.bf16.msra.mxu0 %v395_v5  ;;  %729 = vmatpush.bf16.msra.mxu1 %v395_v5  ;;  %v725_v8 = vld [vmem:[%s1020_s1 + $0x20] sm:$0xff]  ;;  %v239_v14 = vld [vmem:[%s1021_s2 + $0x38] sm:$0xff]  ;;  %v238_v15 = vld [vmem:[%s1021_s2 + $0x30] sm:$0xff] }
  0x2c   : > { %730 = vmatpush.bf16.msra.mxu2 %v395_v5  ;;  %731 = vmatpush.bf16.msra.mxu3 %v395_v5  ;;  %v236_v10 = vld [vmem:[%s1021_s2 + $0x20] sm:$0xff]  ;;  %v722_v16 = vld [vmem:[%s1020_s1 + $0x8] sm:$0xff]  ;;  %v724_v17 = vld [vmem:[%s1020_s1 + $0x18] sm:$0xff] }
  0x2d   : > { %776 = vset.pattern.permute.xlu2 %v818_v4  ;;  %v726_v18 = vld [vmem:[%s1020_s1 + $0x28] sm:$0xff]  ;;  %v728_v19 = vld [vmem:[%s1020_s1 + $0x38] sm:$0xff]  ;;  %v240_v20 = vld [vmem:[%s1021_s2 + $0x40] sm:$0xff] }
  0x2e   : > { %709 = vmatmul.msk.bf16.vlgmr.msra.gmra.mxu0 %vm368_vm1, %v721_v6  ;;  %711 = vmatmul.msk.bf16.vlgmr.msra.gmra.mxu1 %vm368_vm1, %v723_v7  ;;  %v242_v21 = vld [vmem:[%s1021_s2 + $0x50] sm:$0xff]  ;;  %v241_v22 = vld [vmem:[%s1021_s2 + $0x48] sm:$0xff]  ;;  %v243_v23 = vld [vmem:[%s1021_s2 + $0x58] sm:$0xff] }
  0x2f   : > { %713 = vmatmul.msk.bf16.vlgmr.msra.gmra.mxu2 %vm368_vm1, %v725_v8  ;;  %715 = vmatmul.msk.bf16.vlgmr.msra.gmra.mxu3 %vm368_vm1, %v727_v9  ;;  %v245_v24 = vld [vmem:[%s1021_s2 + $0x68] sm:$0xff]  ;;  %v244_v25 = vld [vmem:[%s1021_s2 + $0x60] sm:$0xff]  ;;  %v246_v26 = vld [vmem:[%s1021_s2 + $0x70] sm:$0xff] }
  0x30   : > { %270 = vperm.xlu2 %776, %v236_v10   ;;  %v247_v27 = vld [vmem:[%s1021_s2 + $0x78] sm:$0xff]  ;;  %v462_v41 = vld [vmem:[#allocation2 + $0x30] sm:$0xff]  ;;  %v470_v52 = vld [vmem:[#allocation2 + $0x40] sm:$0xff] }
  0x31   : > { %v466_v42 = vld [vmem:[#allocation2 + $0x50] sm:$0xff]  ;;  %v463_v58 = vld [vmem:[#allocation2] sm:$0xff]  ;;  %v467_v59 = vld [vmem:[#allocation2 + $0x68] sm:$0xff] }
  0x32   : > { %265 = vperm.xlu1 %775, %v235_v11   ;;  %255 = vperm.xlu0 %774, %v233_v12   ;;  %v471_v7 = vld [vmem:[#allocation2 + $0x20] sm:$0xff] }
  0x38   : > { %275 = vperm.xlu2 %776, %v237_v13   ;;  %v464_v13 = vld [vmem:[#allocation2 + $0x58] sm:$0xff] }
  0x3a   : > { %285 = vperm.xlu1 %775, %v239_v14   ;;  %280 = vperm.xlu0 %774, %v238_v15   ;;  %v468_v14 = vld [vmem:[#allocation2 + $0x8] sm:$0xff] }
  0x3e   : > { %710 = vmatmul.msk.bf16.gmra.mxu0 %vm368_vm1, %v722_v16  ;;  %712 = vmatmul.msk.bf16.gmra.mxu1 %vm368_vm1, %v724_v17 }
  0x3f   : > { %714 = vmatmul.msk.bf16.gmra.mxu2 %vm368_vm1, %v726_v18  ;;  %716 = vmatmul.msk.bf16.gmra.mxu3 %vm368_vm1, %v728_v19  ;;  %v475_v19 = vld [vmem:[#allocation2 + $0x70] sm:$0xff] }
  0x40   : > { %290 = vperm.xlu2 %776, %v240_v20   ;;  %v474_v20 = vld [vmem:[#allocation2 + $0x60] sm:$0xff] }
  0x42   : > { %300 = vperm.xlu1 %775, %v242_v21   ;;  %295 = vperm.xlu0 %774, %v241_v22  }
  0x48   : > { %305 = vperm.xlu2 %776, %v243_v23  }
  0x4a   : > { %315 = vperm.xlu1 %775, %v245_v24   ;;  %310 = vperm.xlu0 %774, %v244_v25  }
  0x50   : > { %320 = vperm.xlu2 %776, %v246_v26  }
  0x52   : > { %325 = vperm.xlu0 %774, %v247_v27  }
  0x8a   : > { %v271_v28 = vpop.permute.xlu2 %270 }
  0x92   : > { %v276_v31 = vpop.permute.xlu2 %275 }
  0x9a   : > { %v291_v40 = vpop.permute.xlu2 %290 }
  0x9c   : > { %v261_v29 = vpop.permute.xlu1 %260  ;;  %v251_v30 = vpop.permute.xlu0 %250 }
  0xa2   : > { %v966_v62 = vpop.permute.xlu2 %305 }
  0xa4   : > { %v962_v32 = vpop.permute.xlu1 %265  ;;  %v256_v33 = vpop.permute.xlu0 %255 }
  0xaa   : > { %v321_v26 = vpop.permute.xlu2 %320 }
  0xab   : > { %v406_v34 = vpop.f32.mrf.mxu0  ;;  %v416_v35 = vpop.f32.mrf.mxu1 }
  0xac   : > { %v407_v36 = vadd.f32 %v406_v34, %v251_v30  ;;  %v417_v37 = vadd.f32 %v416_v35, %v271_v28  ;;  %v964_v38 = vpop.permute.xlu1 %285  ;;  %v281_v39 = vpop.permute.xlu0 %280 }
  0xae   : > { %v446_v43 = vmax.f32 %v407_v36, 0.0  ;;  %v450_v44 = vmax.f32 %v417_v37, 0.0  ;;  %v472_v36 = vld [vmem:[#allocation2 + $0x10] sm:$0xff]  ;;  %v476_v37 = vld [vmem:[#allocation2 + $0x78] sm:$0xff] }
  0xb0   : > { %v478_v45 = vadd.f32 %v462_v41, %v446_v43  ;;  %v482_v46 = vadd.f32 %v466_v42, %v450_v44  ;;  %v465_v43 = vld [vmem:[#allocation2 + $0x18] sm:$0xff]  ;;  %v469_v44 = vld [vmem:[#allocation2 + $0x48] sm:$0xff] }
  0xb2   : > { %494 = vst [vmem:[#allocation2 + $0x30] sm:$0xff] %v478_v45  ;;  %v426_v47 = vpop.f32.mrf.mxu2  ;;  %v436_v48 = vpop.f32.mrf.mxu3 }
  0xb3   : > { %498 = vst [vmem:[#allocation2 + $0x50] sm:$0xff] %v482_v46  ;;  %v427_v49 = vadd.f32 %v426_v47, %v291_v40  ;;  %v408_v50 = vpop.f32.mrf.mxu0  ;;  %v418_v51 = vpop.f32.mrf.mxu1 }
  0xb4   : > { %v409_v53 = vadd.f32 %v408_v50, %v256_v33  ;;  %v419_v54 = vadd.f32 %v418_v51, %v276_v31  ;;  %v301_v55 = vpop.permute.xlu1 %300  ;;  %v296_v56 = vpop.permute.xlu0 %295 }
  0xb5   : > { %v454_v57 = vmax.f32 %v427_v49, 0.0 }
  0xb6   : > { %v447_v60 = vmax.f32 %v409_v53, 0.0  ;;  %v451_v61 = vmax.f32 %v419_v54, 0.0  ;;  %v473_v54 = vld [vmem:[#allocation2 + $0x38] sm:$0xff] }
  0xb7   : > { %v486_v63 = vadd.f32 %v470_v52, %v454_v57 }
  0xb8   : > { %v479_v0 = vadd.f32 %v463_v58, %v447_v60  ;;  %v483_v1 = vadd.f32 %v467_v59, %v451_v61 }
  0xb9   : > { %502 = vst [vmem:[#allocation2 + $0x40] sm:$0xff] %v486_v63 }
  0xba   : > { %495 = vst [vmem:[#allocation2] sm:$0xff] %v479_v0  ;;  %v428_v2 = vpop.f32.mrf.mxu2  ;;  %v438_v3 = vpop.f32.mrf.mxu3 }
  0xbb   : > { %499 = vst [vmem:[#allocation2 + $0x68] sm:$0xff] %v483_v1  ;;  %v429_v4 = vadd.f32 %v428_v2, %v296_v56  ;;  %v411_v5 = vpop.f32.mrf.mxu0  ;;  %v421_v6 = vpop.f32.mrf.mxu1 }
  0xbc   : > { %v412_v8 = vadd.f32 %v411_v5, %v261_v29  ;;  %v422_v9 = vadd.f32 %v421_v6, %v281_v39  ;;  %v316_v10 = vpop.permute.xlu1 %315  ;;  %v311_v11 = vpop.permute.xlu0 %310 }
  0xbd   : > { %v455_v12 = vmax.f32 %v429_v4, 0.0  ;;  %v439_v15 = vadd.f32 %v438_v3, %v316_v10  ;;  %v437_v16 = vadd.f32 %v436_v48, %v311_v11 }
  0xbe   : > { %v448_v17 = vmax.f32 %v412_v8, 0.0  ;;  %v452_v18 = vmax.f32 %v422_v9, 0.0 }
  0xbf   : > { %v487_v21 = vadd.f32 %v471_v7, %v455_v12  ;;  %v459_v22 = vmax.f32 %v439_v15, 0.0  ;;  %v458_v23 = vmax.f32 %v437_v16, 0.0 }
  0xc0   : > { %v480_v24 = vadd.f32 %v464_v13, %v448_v17  ;;  %v484_v25 = vadd.f32 %v468_v14, %v452_v18 }
  0xc1   : > { %503 = vst [vmem:[#allocation2 + $0x20] sm:$0xff] %v487_v21  ;;  %v491_v27 = vadd.f32 %v475_v19, %v459_v22  ;;  %v490_v28 = vadd.f32 %v474_v20, %v458_v23 }
  0xc2   : > { %496 = vst [vmem:[#allocation2 + $0x58] sm:$0xff] %v480_v24  ;;  %v431_v29 = vpop.f32.mrf.mxu2  ;;  %v441_v30 = vpop.f32.mrf.mxu3 }
  0xc3   : > { %500 = vst [vmem:[#allocation2 + $0x8] sm:$0xff] %v484_v25  ;;  %v432_v31 = vadd.f32 %v431_v29, %v301_v55  ;;  %v442_v33 = vadd.f32 %v441_v30, %v321_v26  ;;  %v413_v34 = vpop.f32.mrf.mxu0  ;;  %v423_v35 = vpop.f32.mrf.mxu1  ;;  %v477_v55 = vld [vmem:[#allocation2 + $0x28] sm:$0xff] }
  0xc4   : > { %507 = vst [vmem:[#allocation2 + $0x70] sm:$0xff] %v491_v27  ;;  %v414_v39 = vadd.f32 %v413_v34, %v962_v32  ;;  %v424_v40 = vadd.f32 %v423_v35, %v964_v38  ;;  %v326_v51 = vpop.permute.xlu0 %325 }
  0xc5   : > { %506 = vst [vmem:[#allocation2 + $0x60] sm:$0xff] %v490_v28  ;;  %v456_v41 = vmax.f32 %v432_v31, 0.0  ;;  %v460_v42 = vmax.f32 %v442_v33, 0.0 }
  0xc6   : > { %v449_v45 = vmax.f32 %v414_v39, 0.0  ;;  %v453_v46 = vmax.f32 %v424_v40, 0.0 }
  0xc7   : > { %v488_v47 = vadd.f32 %v472_v36, %v456_v41  ;;  %v492_v48 = vadd.f32 %v476_v37, %v460_v42 }
  0xc8   : > { %v481_v49 = vadd.f32 %v465_v43, %v449_v45  ;;  %v485_v50 = vadd.f32 %v469_v44, %v453_v46 }
  0xc9   : > { %504 = vst [vmem:[#allocation2 + $0x10] sm:$0xff] %v488_v47 }
  0xca   : > { %508 = vst [vmem:[#allocation2 + $0x78] sm:$0xff] %v492_v48  ;;  %v433_v52 = vpop.f32.mrf.mxu2  ;;  %v443_v53 = vpop.f32.mrf.mxu3 }
  0xcb   : > { %497 = vst [vmem:[#allocation2 + $0x18] sm:$0xff] %v481_v49  ;;  %v434_v32 = vadd.f32 %v433_v52, %v966_v62  ;;  %v444_v38 = vadd.f32 %v443_v53, %v326_v51 }
  0xcc   : > { %501 = vst [vmem:[#allocation2 + $0x48] sm:$0xff] %v485_v50 }
  0xcd   : > { %v457_v56 = vmax.f32 %v434_v32, 0.0  ;;  %v461_v57 = vmax.f32 %v444_v38, 0.0 }
  0xce   : > { %513 = sbr.rel (%p717_p8) target bundleno = 371 (0x173), region = 40 }
  0xcf   : > { %v489_v58 = vadd.f32 %v473_v54, %v457_v56  ;;  %v493_v59 = vadd.f32 %v477_v55, %v461_v57 }
  0xd1   : > { %505 = vst [vmem:[#allocation2 + $0x38] sm:$0xff] %v489_v58 }
  0xd2   : > { %509 = vst [vmem:[#allocation2 + $0x28] sm:$0xff] %v493_v59 }
  0xd3   : > { %v514_v60 = vld [vmem:[#allocation2 + $0x30] sm:$0xff]  ;;  %v516_v63 = vld [vmem:[#allocation2 + $0x58] sm:$0xff]  ;;  %v515_v62 = vld [vmem:[#allocation2] sm:$0xff]  ;;  %vm578_vm2 = vcmask 7168  }
  0xd4   : > { %v518_v61 = vld [vmem:[#allocation2 + $0x50] sm:$0xff]  ;;  %530 = vadd.xlane.f32.xlu0 %v514_v60  ;;  %534 = vadd.xlane.f32.xlu1 %v516_v63  ;;  %v519_v0 = vld [vmem:[#allocation2 + $0x68] sm:$0xff]  ;;  %v517_v1 = vld [vmem:[#allocation2 + $0x18] sm:$0xff] }
  0xd5   : > { %538 = vadd.xlane.f32.xlu2 %v518_v61  ;;  %v520_v2 = vld [vmem:[#allocation2 + $0x8] sm:$0xff]  ;;  %v522_v3 = vld [vmem:[#allocation2 + $0x40] sm:$0xff]  ;;  %v524_v7 = vld [vmem:[#allocation2 + $0x10] sm:$0xff] }
  0xd6   : > { %v521_v4 = vld [vmem:[#allocation2 + $0x48] sm:$0xff]  ;;  %v523_v5 = vld [vmem:[#allocation2 + $0x20] sm:$0xff]  ;;  %v528_v9 = vld [vmem:[#allocation2 + $0x78] sm:$0xff] }
  0xd7   : > { %v526_v8 = vld [vmem:[#allocation2 + $0x60] sm:$0xff]  ;;  %v527_v10 = vld [vmem:[#allocation2 + $0x70] sm:$0xff] }
  0xd8   : > { %v525_v6 = vld [vmem:[#allocation2 + $0x38] sm:$0xff] }
  0xd9   : > { %v529_v11 = vld [vmem:[#allocation2 + $0x28] sm:$0xff] }
  0xdc   : > { %532 = vadd.xlane.f32.xlu0 %v515_v62  ;;  %536 = vadd.xlane.f32.xlu1 %v517_v1 }
  0xdd   : > { %540 = vadd.xlane.f32.xlu2 %v519_v0 }
  0xe4   : > { %542 = vadd.xlane.f32.xlu0 %v520_v2  ;;  %544 = vadd.xlane.f32.xlu1 %v521_v4 }
  0xe5   : > { %546 = vadd.xlane.f32.xlu2 %v522_v3 }
  0xec   : > { %548 = vadd.xlane.f32.xlu0 %v523_v5  ;;  %550 = vadd.xlane.f32.xlu1 %v524_v7 }
  0xed   : > { %552 = vadd.xlane.f32.xlu2 %v525_v6 }
  0xf4   : > { %554 = vadd.xlane.f32.xlu0 %v526_v8  ;;  %556 = vadd.xlane.f32.xlu1 %v527_v10 }
  0xf5   : > { %558 = vadd.xlane.f32.xlu2 %v528_v9 }
  0xfc   : > { %560 = vadd.xlane.f32.xlu0 %v529_v11 }
 0x147   : > { %v531_v12 = vpop.xlane.xlu0 %530  ;;  %v535_v16 = vpop.xlane.xlu1 %534 }
 0x148   : > { %v539_v13 = vpop.xlane.xlu2 %538  ;;  %v562_v14 = vmul.f32 0.00390625, %v531_v12  ;;  %v564_v17 = vmul.f32 0.00390625, %v535_v16 }
 0x149   : > { %v566_v15 = vmul.f32 0.00390625, %v539_v13 }
 0x14a   : > { %579 = vst.msk [vmem:[%s876_s25] sm:$0xff] %vm578_vm2, %v562_v14 }
 0x14b   : > { %583 = vst.msk [vmem:[%s876_s25 + $0x20] sm:$0xff] %vm578_vm2, %v566_v15 }
 0x14c   : > { %581 = vst.msk [vmem:[%s876_s25 + $0x10] sm:$0xff] %vm578_vm2, %v564_v17 }
 0x14f   : > { %v533_v18 = vpop.xlane.xlu0 %532  ;;  %v537_v22 = vpop.xlane.xlu1 %536 }
 0x150   : > { %v541_v19 = vpop.xlane.xlu2 %540  ;;  %v563_v20 = vmul.f32 0.00390625, %v533_v18  ;;  %v565_v23 = vmul.f32 0.00390625, %v537_v22 }
 0x151   : > { %v567_v21 = vmul.f32 0.00390625, %v541_v19 }
 0x152   : > { %580 = vst.msk [vmem:[%s876_s25 + $0x8] sm:$0xff] %vm578_vm2, %v563_v20 }
 0x153   : > { %584 = vst.msk [vmem:[%s876_s25 + $0x28] sm:$0xff] %vm578_vm2, %v567_v21 }
 0x154   : > { %582 = vst.msk [vmem:[%s876_s25 + $0x18] sm:$0xff] %vm578_vm2, %v565_v23 }
 0x157   : > { %v543_v24 = vpop.xlane.xlu0 %542  ;;  %v545_v28 = vpop.xlane.xlu1 %544 }
 0x158   : > { %v547_v25 = vpop.xlane.xlu2 %546  ;;  %v568_v26 = vmul.f32 0.00390625, %v543_v24  ;;  %v569_v29 = vmul.f32 0.00390625, %v545_v28 }
 0x159   : > { %v570_v27 = vmul.f32 0.00390625, %v547_v25 }
 0x15a   : > { %585 = vst.msk [vmem:[%s876_s25 + $0x30] sm:$0xff] %vm578_vm2, %v568_v26 }
 0x15b   : > { %587 = vst.msk [vmem:[%s876_s25 + $0x40] sm:$0xff] %vm578_vm2, %v570_v27 }
 0x15c   : > { %586 = vst.msk [vmem:[%s876_s25 + $0x38] sm:$0xff] %vm578_vm2, %v569_v29 }
 0x15f   : > { %v549_v30 = vpop.xlane.xlu0 %548  ;;  %v551_v35 = vpop.xlane.xlu1 %550 }
 0x160   : > { %v553_v31 = vpop.xlane.xlu2 %552  ;;  %v571_v33 = vmul.f32 0.00390625, %v549_v30  ;;  %v572_v36 = vmul.f32 0.00390625, %v551_v35 }
 0x161   : > { %v573_v34 = vmul.f32 0.00390625, %v553_v31 }
 0x162   : > { %588 = vst.msk [vmem:[%s876_s25 + $0x48] sm:$0xff] %vm578_vm2, %v571_v33 }
 0x163   : > { %590 = vst.msk [vmem:[%s876_s25 + $0x58] sm:$0xff] %vm578_vm2, %v573_v34 }
 0x164   : > { %589 = vst.msk [vmem:[%s876_s25 + $0x50] sm:$0xff] %vm578_vm2, %v572_v36 }
 0x167   : > { %v555_v37 = vpop.xlane.xlu0 %554  ;;  %v557_v42 = vpop.xlane.xlu1 %556 }
 0x168   : > { %v559_v39 = vpop.xlane.xlu2 %558  ;;  %v574_v40 = vmul.f32 0.00390625, %v555_v37  ;;  %v575_v43 = vmul.f32 0.00390625, %v557_v42 }
 0x169   : > { %v576_v41 = vmul.f32 0.00390625, %v559_v39 }
 0x16a   : > { %591 = vst.msk [vmem:[%s876_s25 + $0x60] sm:$0xff] %vm578_vm2, %v574_v40 }
 0x16b   : > { %593 = vst.msk [vmem:[%s876_s25 + $0x70] sm:$0xff] %vm578_vm2, %v576_v41 }
 0x16c   : > { %592 = vst.msk [vmem:[%s876_s25 + $0x68] sm:$0xff] %vm578_vm2, %v575_v43 }
 0x16f   : > { %v561_v44 = vpop.xlane.xlu0 %560 }
 0x170   : > { %v577_v45 = vmul.f32 0.00390625, %v561_v44 }
 0x172   : > { %594 = vst.msk [vmem:[%s876_s25 + $0x78] sm:$0xff] %vm578_vm2, %v577_v45 }
 0x173 PF: > { %s13_s16 = sadd.s32 1, %s815_s16   ;;  %s1023_s12 = smov %s807_s14 }
 0x174   : > { %p10_p9 = scmp.ge.s32.totalorder %s13_s16, 6   ;;  %s1024_s13 = smov %s811_s15 }
 0x175   : > { %s1025_s14 = smov %s1028_s17  ;;  %s1026_s15 = smov %s1032_s18 }
 0x176   :  { %12 = sbr.rel (!%p10_p9) target bundleno = 3 (0x3), region = 70 }

</bundles_post_ra>
